<compile_context>
chip_gen: v5e
topology: v5e:2x2
jax: 0.10.0
libtpu: 0.0.40
codegen_flags: <defaults>
</compile_context>

<pallas_src>
import functools

import jax
import jax.numpy as jnp
from jax.experimental import pallas as pl
from jax.experimental.pallas import tpu as pltpu


def _layernorm2d_kernel(x_ref, w_ref, b_ref, o_ref, *, eps, inv_c):
    # x_ref: (1, C, T) block — C on sublanes, spatial tile T on lanes.
    # w_ref / b_ref: (C, 1) full params, resident across grid steps.
    x = x_ref[0].astype(jnp.float32)                      # (C, T)

    # Two-pass (in VMEM) statistics: identical math to the PyTorch reference.
    mu = jnp.sum(x, axis=0, keepdims=True) * inv_c        # (1, T)
    d = x - mu
    var = jnp.sum(d * d, axis=0, keepdims=True) * inv_c   # (1, T) biased var

    y = d * jax.lax.rsqrt(var + eps)                      # (C, T)

    w = w_ref[...].astype(jnp.float32)                    # (C, 1)
    b = b_ref[...].astype(jnp.float32)                    # (C, 1)
    o_ref[0] = (w * y + b).astype(o_ref.dtype)


def _sublane_granule(itemsize):
    # 32-bit: 8 sublanes; 16-bit packs 2/sublane; 8-bit packs 4/sublane.
    return {4: 8, 2: 16, 1: 32}.get(int(itemsize), 8)


def _vmem_budget_bytes():
    # Generation-aware VMEM budget with ~25% headroom for compiler scratch.
    try:
        cap = int(pltpu.get_tpu_info().vmem_capacity_bytes)
    except Exception:
        cap = 64 << 20  # conservative (v7x per-TC capacity)
    return (cap * 3) // 4


def _choose_tile_hw(hw, c_padded, itemsize, vmem_budget, target_bytes=6 << 20):
    """Balanced lane tiles: multiple of 128 (or full extent), ~target_bytes."""
    if hw <= 128:
        return int(hw)                                    # full extent is legal
    lanes_target = max(128, target_bytes // max(1, c_padded * itemsize))
    nt = pl.cdiv(hw, lanes_target)                        # number of tiles
    tile = pl.cdiv(pl.cdiv(hw, nt), 128) * 128            # even split, 128-align
    if tile >= hw:
        tile = hw                                         # single full-extent block
    # Shrink if double-buffered in+out blocks would exceed the VMEM budget.
    while tile > 128 and 6 * c_padded * tile * itemsize > vmem_budget:
        tile = max(128, ((tile // 2) // 128) * 128)
    return int(tile)


def _layernorm2d_jax(x, weight, bias, eps):
    # Pure-JAX path (small-shape fallback), numerics identical to the kernel.
    C = x.shape[1]
    x32 = x.astype(jnp.float32)
    mu = jnp.mean(x32, axis=1, keepdims=True)
    var = jnp.mean((x32 - mu) ** 2, axis=1, keepdims=True)
    y = (x32 - mu) * jax.lax.rsqrt(var + eps)
    out = (weight.reshape(1, C, 1, 1).astype(jnp.float32) * y
           + bias.reshape(1, C, 1, 1).astype(jnp.float32))
    return out.astype(x.dtype)


def layernorm2d(x_nchw, weight, bias, eps=1e-6, *, tile_hw=None,
                force_pallas=False):
    """LayerNorm over the channel dim of an NCHW tensor (matches LayerNorm2d)."""
    N, C, H, W = x_nchw.shape
    HW = H * W
    itemsize = jnp.dtype(x_nchw.dtype).itemsize
    granule = _sublane_granule(itemsize)

    # Small-shape fallback: lane width < 128 -> every store is a masked
    # vst.msk; C below the sublane granule -> vregs mostly padding. There,
    # fixed pallas_call + per-step overhead dominates and XLA fusion wins.
    if not force_pallas and (HW < 128 or C < granule):
        return _layernorm2d_jax(x_nchw, weight, bias, eps)

    # Free reshape only — keeps native memory layout.
    x3 = x_nchw.reshape(N, C, HW)

    c_padded = pl.cdiv(C, granule) * granule              # sublane-padded C
    vmem_budget = _vmem_budget_bytes()
    if tile_hw is None:
        tile_hw = _choose_tile_hw(HW, c_padded, itemsize, vmem_budget)

    w2d = weight.reshape(C, 1)
    b2d = bias.reshape(C, 1)

    grid = (N, pl.cdiv(HW, tile_hw))

    # VMEM accounting with sublane padding: in + out, double-buffered, + params.
    block_bytes = c_padded * tile_hw * itemsize
    needed = 6 * block_bytes + (2 << 20)
    vmem_limit = int(min(vmem_budget, max(16 << 20, needed)))

    cost = pl.CostEstimate(
        flops=8 * N * C * HW,
        transcendentals=N * HW,
        bytes_accessed=2 * N * C * HW * itemsize
        + 2 * C * jnp.dtype(weight.dtype).itemsize,
    )

    out = pl.pallas_call(
        functools.partial(_layernorm2d_kernel, eps=float(eps), inv_c=1.0 / C),
        out_shape=jax.ShapeDtypeStruct((N, C, HW), x_nchw.dtype),
        grid_spec=pltpu.PrefetchScalarGridSpec(
            num_scalar_prefetch=0,
            grid=grid,
            in_specs=[
                pl.BlockSpec((1, C, tile_hw), lambda n, j: (n, 0, j)),  # x tile
                pl.BlockSpec((C, 1), lambda n, j: (0, 0)),              # weight
                pl.BlockSpec((C, 1), lambda n, j: (0, 0)),              # bias
            ],
            out_specs=pl.BlockSpec((1, C, tile_hw), lambda n, j: (n, 0, j)),
        ),
        compiler_params=pltpu.CompilerParams(
            dimension_semantics=("parallel", "parallel"),
            vmem_limit_bytes=vmem_limit,
        ),
        cost_estimate=cost,
    )(x3, w2d, b2d)

    return out.reshape(N, C, H, W)


def layernorm2d_ref(x, weight, bias, eps=1e-6):
    # Pure-JAX reference mirroring the PyTorch forward exactly.
    mu = jnp.mean(x, axis=1, keepdims=True)
    var = jnp.mean((x - mu) ** 2, axis=1, keepdims=True)
    y = (x - mu) / jnp.sqrt(var + eps)
    C = x.shape[1]
    return weight.reshape(1, C, 1, 1) * y + bias.reshape(1, C, 1, 1)


if __name__ == "__main__":
    key = jax.random.PRNGKey(0)

    # 1) Primary test at the module's expected small shape — force the Pallas
    #    path (C=4 would otherwise hit the small-shape fallback).
    N, C, H, W = 2, 4, 16, 16
    x = jax.random.normal(key, (N, C, H, W), dtype=jnp.float32)
    weight = jnp.ones((C,), dtype=jnp.float32)   # nn.Parameter(torch.ones(C))
    bias = jnp.zeros((C,), dtype=jnp.float32)    # nn.Parameter(torch.zeros(C))

    out = jax.block_until_ready(layernorm2d(x, weight, bias, eps=1e-6,
                                            force_pallas=True))
    ref = layernorm2d_ref(x, weight, bias, eps=1e-6)
    assert out.shape == (N, C, H, W)
    assert jnp.allclose(out, ref, atol=1e-4, rtol=1e-4), "mismatch vs reference"

    # 2) Natural Pallas path (HW not a multiple of 128 -> single full-extent
    #    block), non-trivial weight/bias.
    N2, C2, H2, W2 = 1, 8, 12, 12
    key, k1, k2, k3 = jax.random.split(key, 4)
    x2 = jax.random.normal(k1, (N2, C2, H2, W2), dtype=jnp.float32)
    w2 = jax.random.normal(k2, (C2,), dtype=jnp.float32)
    b2 = jax.random.normal(k3, (C2,), dtype=jnp.float32)
    out2 = jax.block_until_ready(layernorm2d(x2, w2, b2, eps=1e-6))
    ref2 = layernorm2d_ref(x2, w2, b2, eps=1e-6)
    assert jnp.allclose(out2, ref2, atol=1e-4, rtol=1e-4), "mismatch (full-extent)"

    # 3) Multi-tile + partial last block path (explicit small tile_hw so the
    #    pipelined / masked-tail code path is exercised at small size).
    N3, C3, H3, W3 = 1, 16, 24, 24        # HW = 576 = 4*128 + 64
    key, k4, k5, k6 = jax.random.split(key, 4)
    x3 = jax.random.normal(k4, (N3, C3, H3, W3), dtype=jnp.float32)
    w3 = jax.random.normal(k5, (C3,), dtype=jnp.float32)
    b3 = jax.random.normal(k6, (C3,), dtype=jnp.float32)
    out3 = jax.block_until_ready(layernorm2d(x3, w3, b3, eps=1e-6, tile_hw=128))
    ref3 = layernorm2d_ref(x3, w3, b3, eps=1e-6)
    assert jnp.allclose(out3, ref3, atol=1e-4, rtol=1e-4), "mismatch (multi-tile)"

    # 4) Small-shape fallback path (HW < 128 and C < granule -> pure JAX).
    x4 = jax.random.normal(key, (2, 4, 8, 8), dtype=jnp.float32)
    out4 = jax.block_until_ready(layernorm2d(x4, weight, bias, eps=1e-6))
    ref4 = layernorm2d_ref(x4, weight, bias, eps=1e-6)
    assert jnp.allclose(out4, ref4, atol=1e-4, rtol=1e-4), "mismatch (fallback)"

    print("KERNEL_OK")
</pallas_src>

<mosaic_0001>
module attributes {stable_mosaic.version = 11 : i64} {
  func.func @_layernorm2d_kernel(%arg0: i32, %arg1: i32, %arg2: memref<1x4x256xf32, #tpu.memory_space<vmem>>, %arg3: memref<4x1xf32, #tpu.memory_space<vmem>>, %arg4: memref<4x1xf32, #tpu.memory_space<vmem>>, %arg5: memref<1x4x256xf32, #tpu.memory_space<vmem>>) attributes {dimension_semantics = [#tpu.dimension_semantics<parallel>, #tpu.dimension_semantics<parallel>], iteration_bounds = array<i64: 2, 1>, scalar_prefetch = 0 : i64, scratch_operands = 0 : i64, tpu.core_type = #tpu.core_type<tc>, window_params = [{transform_indices = @transform_0, window_bounds = array<i64: 1, 4, 256>}, {pipeline_mode = #tpu.pipeline_mode<synchronous>, transform_indices = @transform_1, window_bounds = array<i64: 4, 1>}, {pipeline_mode = #tpu.pipeline_mode<synchronous>, transform_indices = @transform_2, window_bounds = array<i64: 4, 1>}, {transform_indices = @transform_3, window_bounds = array<i64: 1, 4, 256>}]} {
    %c0 = arith.constant 0 : index
    %c0_0 = arith.constant 0 : index
    %c0_1 = arith.constant 0 : index
    %0 = vector.load %arg2[%c0, %c0_0, %c0_1] : memref<1x4x256xf32, #tpu.memory_space<vmem>>, vector<1x4x256xf32>
    %1 = vector.shape_cast %0 : vector<1x4x256xf32> to vector<4x256xf32>
    %cst = arith.constant dense<0.000000e+00> : vector<256xf32>
    %2 = vector.multi_reduction <add>, %1, %cst [0] : vector<4x256xf32> to vector<256xf32>
    %3 = vector.shape_cast %2 : vector<256xf32> to vector<1x256xf32>
    %cst_2 = arith.constant 2.500000e-01 : f32
    %4 = vector.broadcast %cst_2 : f32 to vector<1x256xf32>
    %5 = arith.mulf %3, %4 : vector<1x256xf32>
    %6 = vector.broadcast %5 : vector<1x256xf32> to vector<4x256xf32>
    %7 = arith.subf %1, %6 : vector<4x256xf32>
    %8 = arith.mulf %7, %7 : vector<4x256xf32>
    %cst_3 = arith.constant dense<0.000000e+00> : vector<256xf32>
    %9 = vector.multi_reduction <add>, %8, %cst_3 [0] : vector<4x256xf32> to vector<256xf32>
    %10 = vector.shape_cast %9 : vector<256xf32> to vector<1x256xf32>
    %cst_4 = arith.constant 2.500000e-01 : f32
    %11 = vector.broadcast %cst_4 : f32 to vector<1x256xf32>
    %12 = arith.mulf %10, %11 : vector<1x256xf32>
    %cst_5 = arith.constant 9.99999997E-7 : f32
    %13 = vector.broadcast %cst_5 : f32 to vector<1x256xf32>
    %14 = arith.addf %12, %13 : vector<1x256xf32>
    %15 = math.rsqrt %14 : vector<1x256xf32>
    %16 = vector.broadcast %15 : vector<1x256xf32> to vector<4x256xf32>
    %17 = arith.mulf %7, %16 : vector<4x256xf32>
    %c0_6 = arith.constant 0 : index
    %c0_7 = arith.constant 0 : index
    %18 = vector.load %arg3[%c0_6, %c0_7] : memref<4x1xf32, #tpu.memory_space<vmem>>, vector<4x1xf32>
    %c0_8 = arith.constant 0 : index
    %c0_9 = arith.constant 0 : index
    %19 = vector.load %arg4[%c0_8, %c0_9] : memref<4x1xf32, #tpu.memory_space<vmem>>, vector<4x1xf32>
    %20 = vector.broadcast %18 : vector<4x1xf32> to vector<4x256xf32>
    %21 = arith.mulf %20, %17 : vector<4x256xf32>
    %22 = vector.broadcast %19 : vector<4x1xf32> to vector<4x256xf32>
    %23 = arith.addf %21, %22 : vector<4x256xf32>
    %c0_10 = arith.constant 0 : index
    %c0_11 = arith.constant 0 : index
    %c0_12 = arith.constant 0 : index
    %24 = vector.load %arg5[%c0_10, %c0_11, %c0_12] : memref<1x4x256xf32, #tpu.memory_space<vmem>>, vector<1x4x256xf32>
    %25 = vector.shape_cast %24 : vector<1x4x256xf32> to vector<4x256xf32>
    %26 = vector.shape_cast %23 : vector<4x256xf32> to vector<1x4x256xf32>
    tpu.vector_store %arg5[%c0_10, %c0_11, %c0_12], %26 {strides = array<i32>} : memref<1x4x256xf32, #tpu.memory_space<vmem>>, vector<1x4x256xf32>,
    return
  }
  func.func @transform_0(%arg0: i32, %arg1: i32) -> (i32, i32, i32) {
    %c0_i32 = arith.constant 0 : i32
    %c0_i32_0 = arith.constant 0 : i32
    return %arg0, %c0_i32, %arg1 : i32, i32, i32
  }
  func.func @transform_1(%arg0: i32, %arg1: i32) -> (i32, i32) {
    %c0_i32 = arith.constant 0 : i32
    %c0_i32_0 = arith.constant 0 : i32
    %c0_i32_1 = arith.constant 0 : i32
    return %c0_i32, %c0_i32_0 : i32, i32
  }
  func.func @transform_2(%arg0: i32, %arg1: i32) -> (i32, i32) {
    %c0_i32 = arith.constant 0 : i32
    %c0_i32_0 = arith.constant 0 : i32
    %c0_i32_1 = arith.constant 0 : i32
    return %c0_i32, %c0_i32_0 : i32, i32
  }
  func.func @transform_3(%arg0: i32, %arg1: i32) -> (i32, i32, i32) {
    %c0_i32 = arith.constant 0 : i32
    %c0_i32_0 = arith.constant 0 : i32
    return %arg0, %c0_i32, %arg1 : i32, i32, i32
  }
}

</mosaic_0001>

<bundles_post_ra>
// kernel: tpu_custom_call.1
= control target key start
LH: loop header
LB: loop body
LE: loop exit
PB: predicated region body
PF: predicated region fallthrough
CT: control target
= control target key end

     0   :  { %8 = vsyncpa [#allocation3], 0  ;;  %s778_s0 = inlined_call_operand.hbm [shape: f32[2,4,256], index: 0, kind: input, shape index: {}]   ;;  %s779_s1 = inlined_call_operand.vmem [shape: f32[4,1], index: 1, kind: input, shape index: {}]   ;;  %s780_s2 = inlined_call_operand.vmem [shape: f32[4,1], index: 2, kind: input, shape index: {}]   ;;  %s781_s3 = inlined_call_operand.hbm [shape: f32[2,4,256], index: 3, kind: output, shape index: {}]  }
   0x1   :  { %10 = vsyncpa [#allocation3 + $0x1], 0 }
   0x2   :  { %11 = vsyncpa [#allocation4], 0 }
   0x3   :  { %13 = vsyncpa [#allocation4 + $0x1], 0  ;;  %s641_s12 = smov 0   ;;  %s643_s13 = smov 0  }
   0x4   :  { %s645_s14 = smov 0   ;;  %s647_s15 = smov 0  }
   0x5   :  { %s649_s16 = smov 0   ;;  %s651_s17 = smov 0  }
   0x6 LB: > { %s421_s18 = sadd.s32 4294967295, %s618_s17   ;;  %s422_s19 = sadd.s32 4294967294, %s618_s17   ;;  %s618_s17 = sphi %s651_s17, %s19_s17   ;;  %s614_s16 = sphi %s649_s16, %s790_s16   ;;  %s610_s15 = sphi %s647_s15, %s789_s15   ;;  %s606_s14 = sphi %s645_s14, %s788_s14   ;;  %s602_s13 = sphi %s643_s13, %s787_s13   ;;  %s598_s12 = sphi %s641_s12, %s786_s12  }
   0x7   : > { %s31_s20 = sadd.s32 1, %s614_s16  ;;  %s40_s21 = sadd.s32 1, %s606_s14 }
   0x8   : > { %p33_p0 = scmp.ge.s32.totalorder %s31_s20, 2  ;;  %p47_p1 = scmp.ne.s32.totalorder %s606_s14, %s602_s13 }
   0x9   : > { %p48_p2 = scmp.eq.s32.totalorder %s618_s17, 0  ;;  %p53_p3 = scmp.ne.s32.totalorder %s602_s13, %s598_s12 }
   0xa   : > { %s792_s20 = smov (%p33_p0, %s31_s20), 0  ;;  %p54_p5 = scmp.eq.s32.totalorder %s421_s18, 0 }
   0xb   : > { %p682_p4 = por %p48_p2, %p47_p1  ;;  %s35_s23 = ssub.s32 %s614_s16, %s792_s20 }
   0xc   : > { %p121_p6 = scmp.eq.s32.totalorder %s421_s18, 1  ;;  %p38_p7 = scmp.eq.s32.totalorder %s35_s23, 0 }
   0xd   : > { %p688_p8 = por %p54_p5, %p53_p3  ;;  %p127_p10 = scmp.eq.s32.totalorder %s422_s19, 1 }
   0xe   : > { %p692_p9 = por %p121_p6, %p47_p1  ;;  %p424_p12 = scmp.ge.s32.totalorder %s618_s17, 2 }
   0xf   : > { %s697_s26 = scalar_select %p38_p7, %s606_s14, %s40_s21  }
  0x10   : > { %p699_p11 = por %p127_p10, %p53_p3  ;;  %p450_p13 = scmp.lt.s32.totalorder %s618_s17, 2 }
  0x11   : > { %s153_s28 = sand.u32 1, %s606_s14   ;;  %s436_s30 = sshll.u32 %s614_s16, 3 }
  0x12   : > { %s425_s29 = sshll.u32 %s153_s28, 3  ;;  %s164_s6 = scalar_lea.hbm %s778_s0, %s436_s30 }
  0x13   : > { %s157_s7 = scalar_lea.vmem [#allocation2], %s425_s29  ;;  %s166_s9 = sshll.u32 %s164_s6, 4  ;;  %s167_s9 = int_to_ptr.hbm [resolvable:$true] %s166_s9 }
  0x14   : > { %s168_s8 = sshll.u32 %s157_s7, 4  ;;  %p443_p0 = pnand %p450_p13, %p682_p4  ;;  %s169_s8 = int_to_ptr.vmem [resolvable:$true] %s168_s8 }
  0x15   : > { %p428_p1 = scmp.ge.s32.totalorder %s618_s17, 1  ;;  %p173_p2 = scmp.lt.s32.totalorder %s618_s17, 3 }
  0x16   : > { %s154_s10 = scalar_lea.sflag [#allocation3], %s153_s28 }
  0x17   : > { %445 = dma.hbm_to_vmem [thread:$0]  (!%p443_p0), %s167_s9, 128, %s169_s8, %s154_s10  }
  0x18   : > { %p174_p3 = pnand %p428_p1, %p173_p2 }
  0x19   : > { %s715_s11 = sand.u32 (!%p174_p3), 1, %s602_s13  }
  0x1a   : > { %177 = sbr.rel (%p174_p3) target bundleno = 165 (0xa5), region = 32  ;;  %s429_s18 = sshll.u32 (!%p174_p3), %s715_s11, 3 }
  0x1b   : > { %s180_s19 = scalar_lea.sflag (!%p174_p3), [#allocation3], %s715_s11  ;;  %s183_s21 = scalar_lea.vmem (!%p174_p3), [#allocation2], %s429_s18 }
  0x1f   : > { %589 = dma.done.wait (%p688_p8), %s180_s19, 128  }
  0x20   : > { %591 = vsyncadd (%p688_p8), %s180_s19, 4294967168  ;;  %v620_v0 = vmov 0   ;;  %v209_v1 = vld [vmem:[%s183_s21] sm:$0xff]  ;;  %v290_v2 = vld [vmem:[%s779_s1] sm:$0xf]  ;;  %vm216_vm0 = vcmask 1043456  }
  0x21   : > { %501 = vset.pattern.permute.xlu0 %v620_v0  ;;  %211 = vst [vmem:[#allocation1] ss:$2 sm:$0xff] %v209_v1  ;;  %v291_v3 = vld [vmem:[%s780_s2] sm:$0xf]  ;;  %s437_s24 = sshll.u32 %s610_s15, 3  ;;  %s206_s6 = scalar_lea.vmem [#allocation5], %s429_s18 }
  0x22   : > { %294 = vperm.xlu0 %501, %v290_v2   ;;  %s332_s5 = scalar_lea.hbm %s781_s3, %s437_s24  ;;  %s334_s7 = sshll.u32 %s206_s6, 4  ;;  %s335_s7 = int_to_ptr.vmem [resolvable:$true] %s334_s7 }
  0x23   : > { %s336_s8 = sshll.u32 %s332_s5, 4  ;;  %s319_s15 = scalar_lea.sflag [#allocation4], %s715_s11  ;;  %s337_s8 = int_to_ptr.hbm [resolvable:$true] %s336_s8 }
  0x24   : > { %s550_s9 = sshra.s32 %s337_s8, 4  ;;  %s556_s18 = scalar_lea.hbm %s781_s3, 16  ;;  %s551_s9 = int_to_ptr.hbm [resolvable:$true] %s550_s9 }
  0x25   : > { %s552_s10 = scalar_lea.hbm %s551_s9, 8  ;;  %p557_p7 = scmp.lt.s32.totalorder %s551_s9, %s781_s3 }
  0x26   : > { %p553_p4 = scmp.ne.s32.totalorder %s551_s9, %s552_s10  ;;  %p558_p8 = scmp.lt.s32.totalorder %s556_s18, %s552_s10 }
  0x28   : > { %v212_v4 = vld.sshfl [vmem:[#allocation1] sm:$0xff pattern:$0x75316420]  ;;  %v213_v5 = vld.sshfl [vmem:[#allocation1 + $0x8] sm:$0xff pattern:$0x75316420]  ;;  %p554_p5 = pnand %p553_p4, %p692_p9  ;;  %p559_p10 = por %p558_p8, %p557_p7 }
  0x29   : > { %v217_v6 = vsel %vm216_vm0, %v212_v4, 0.0  ;;  %v224_v7 = vsel %vm216_vm0, %v213_v5, 0.0 }
  0x2a   : > { %307 = vperm.xlu0 %501, %v291_v3   ;;  %v218_v8 = vrot.slane %v217_v6, 4  ;;  %v225_v9 = vrot.slane %v224_v7, 4  ;;  %p555_p6 = pneg %p554_p5 }
  0x2c   : > { %v219_v10 = vadd.f32 %v218_v8, %v217_v6  ;;  %v226_v11 = vadd.f32 %v225_v9, %v224_v7  ;;  %p560_p13 = pnand %p559_p10, %p555_p6 }
  0x2e   : > { %v220_v12 = vrot.slane %v219_v10, 2  ;;  %v227_v13 = vrot.slane %v226_v11, 2 }
  0x30   : > { %v221_v14 = vadd.f32 %v220_v12, %v219_v10  ;;  %v228_v15 = vadd.f32 %v227_v13, %v226_v11 }
  0x32   : > { %v222_v16 = vrot.slane %v221_v14, 1  ;;  %v229_v17 = vrot.slane %v228_v15, 1 }
  0x34   : > { %v223_v18 = vadd.f32 %v222_v16, %v221_v14  ;;  %v230_v19 = vadd.f32 %v229_v17, %v228_v15 }
  0x36   : > { %v231_v20 = vmul.f32 0.25, %v223_v18  ;;  %v232_v21 = vmul.f32 0.25, %v230_v19 }
  0x38   : > { %v235_v22 = vrot.slane %v232_v21, 4 }
  0x3a   : > { %v236_v23 = vsel %vm216_vm0, %v231_v20, %v235_v22 }
  0x3b   : > { %v238_v24 = vsub.f32 %v209_v1, %v236_v23 }
  0x3d   : > { %v239_v25 = vmul.f32 %v238_v24, %v238_v24 }
  0x3f   : > { %241 = vst [vmem:[#allocation1] ss:$2 sm:$0xff] %v239_v25 }
  0x46   : > { %v242_v26 = vld.sshfl [vmem:[#allocation1] sm:$0xff pattern:$0x75316420]  ;;  %v243_v27 = vld.sshfl [vmem:[#allocation1 + $0x8] sm:$0xff pattern:$0x75316420] }
  0x47   : > { %v246_v28 = vsel %vm216_vm0, %v242_v26, 0.0  ;;  %v253_v29 = vsel %vm216_vm0, %v243_v27, 0.0 }
  0x48   : > { %v247_v30 = vrot.slane %v246_v28, 4  ;;  %v254_v31 = vrot.slane %v253_v29, 4 }
  0x4a   : > { %v248_v32 = vadd.f32 %v247_v30, %v246_v28  ;;  %v255_v33 = vadd.f32 %v254_v31, %v253_v29 }
  0x4c   : > { %v249_v34 = vrot.slane %v248_v32, 2  ;;  %v256_v35 = vrot.slane %v255_v33, 2 }
  0x4e   : > { %v250_v36 = vadd.f32 %v249_v34, %v248_v32  ;;  %v257_v37 = vadd.f32 %v256_v35, %v255_v33 }
  0x50   : > { %v251_v38 = vrot.slane %v250_v36, 1  ;;  %v258_v39 = vrot.slane %v257_v37, 1 }
  0x52   : > { %v252_v40 = vadd.f32 %v251_v38, %v250_v36  ;;  %v259_v41 = vadd.f32 %v258_v39, %v257_v37 }
  0x54   : > { %v260_v42 = vmul.f32 0.25, %v252_v40  ;;  %v261_v43 = vmul.f32 0.25, %v259_v41 }
  0x56   : > { %v262_v44 = vadd.f32 1e-06, %v260_v42  ;;  %v263_v45 = vadd.f32 1e-06, %v261_v43 }
  0x58   : > { %502 = vrsqrt.f32 %v262_v44  ;;  %vm280_vm1 = vweird.f32 %v263_v45  ;;  %vm270_vm3 = vweird.f32 %v262_v44 }
  0x59   : > { %504 = vrsqrt.f32 %v263_v45 }
  0x5e   : > { %v503_v46 = vpop.eup %502 }
  0x5f   : > { %v505_v47 = vpop.eup %504  ;;  %v265_v48 = vmul.f32 %v503_v46, %v262_v44  ;;  %vm271_vm4 = vweird.f32 %v503_v46 }
  0x60   : > { %v275_v49 = vmul.f32 %v505_v47, %v263_v45  ;;  %vm281_vm2 = vweird.f32 %v505_v47  ;;  %vm272_vm6 = vmor %vm270_vm3, %vm271_vm4 }
  0x61   : > { %v266_v50 = vmul.f32 %v503_v46, %v265_v48  ;;  %vm282_vm5 = vmor %vm280_vm1, %vm281_vm2 }
  0x62   : > { %v276_v51 = vmul.f32 %v505_v47, %v275_v49 }
  0x63   : > { %v267_v52 = vmul.f32 0.5, %v266_v50 }
  0x64   : > { %v277_v53 = vmul.f32 0.5, %v276_v51 }
  0x65   : > { %v268_v54 = vsub.f32 1.5, %v267_v52 }
  0x66   : > { %v278_v55 = vsub.f32 1.5, %v277_v53 }
  0x67   : > { %v269_v56 = vmul.f32 %v503_v46, %v268_v54 }
  0x68   : > { %v279_v57 = vmul.f32 %v505_v47, %v278_v55 }
  0x69   : > { %v273_v58 = vsel %vm272_vm6, %v503_v46, %v269_v56 }
  0x6a   : > { %v283_v59 = vsel %vm282_vm5, %v505_v47, %v279_v57 }
  0x6b   : > { %v286_v60 = vrot.slane %v283_v59, 4 }
  0x6d   : > { %v287_v61 = vsel %vm216_vm0, %v273_v58, %v286_v60 }
  0x6e   : > { %v289_v62 = vmul.f32 %v287_v61, %v238_v24 }
  0x70   : > { %298 = vst [vmem:[#allocation1] ss:$2 sm:$0xff] %v289_v62 }
  0x77   : > { %v300_v0 = vld.sshfl [vmem:[#allocation1 + $0x8] sm:$0xff pattern:$0x75316420]  ;;  %v299_v1 = vld.sshfl [vmem:[#allocation1] sm:$0xff pattern:$0x75316420] }
  0x94   : > { %v295_v63 = vpop.permute.xlu0 %294 }
  0x95   : > { %v304_v2 = vmul.f32 %v300_v0, %v295_v63  ;;  %v303_v4 = vmul.f32 %v299_v1, %v295_v63 }
  0x9c   : > { %v308_v3 = vpop.permute.xlu0 %307 }
  0x9d   : > { %v311_v5 = vadd.f32 %v308_v3, %v304_v2  ;;  %v310_v6 = vadd.f32 %v308_v3, %v303_v4 }
  0x9f   : > { %v314_v7 = vrot.slane %v311_v5, 4 }
  0xa1   : > { %v315_v8 = vsel %vm216_vm0, %v310_v6, %v314_v7 }
  0xa2   : > { %317 = vst [vmem:[%s206_s6] sm:$0xff] %v315_v8 }
  0xa3   : > { %563 = shalt.err (!%p560_p13)
}
  0xa4   : > { %440 = dma.vmem_to_hbm [thread:$0]  (%p692_p9), %s335_s7, 128, %s337_s8, %s319_s15  }
  0xa5 PF: > { %s348_s11 = sand.u32 1, %s598_s12   ;;  %p447_p0 = pnand %p424_p12, %p699_p11 }
  0xa6   : > { %s349_s28 = scalar_lea.sflag [#allocation4], %s348_s11 }
  0xa7   : > { %p448_p1 = pneg %p447_p0 }
  0xa9   : > { %593 = dma.done.wait (%p448_p1), %s349_s28, 128  }
  0xaa   : > { %595 = vsyncadd (%p448_p1), %s349_s28, 4294967168  ;;  %s19_s17 = sadd.s32 1, %s618_s17   ;;  %s786_s12 = smov %s602_s13 }
  0xab   : > { %p16_p2 = scmp.ge.s32.totalorder %s19_s17, 4   ;;  %s787_s13 = smov %s606_s14 }
  0xac   : > { %s788_s14 = smov %s697_s26  ;;  %s789_s15 = smov %s614_s16 }
  0xad   : > { %s790_s16 = smov %s792_s20  ;;  %18 = sbr.rel (!%p16_p2) target bundleno = 6 (0x6), region = 77 }
  0xb2   :  { %355 = vsyncpa [#allocation3], 1 }
  0xb3   :  { %357 = vsyncpa [#allocation3 + $0x1], 1 }
  0xb4   :  { %358 = vsyncpa [#allocation4], 1 }
  0xb5   :  { %360 = vsyncpa [#allocation4 + $0x1], 1 }

</bundles_post_ra>
